<compile_context>
chip_gen: v5e
topology: v5e:2x2
jax: 0.10.0
libtpu: 0.0.40
codegen_flags: <defaults>
</compile_context>

<pallas_src>
import jax
import jax.numpy as jnp
import numpy as np
from jax.experimental import pallas as pl
from jax.experimental.pallas import tpu as pltpu


# ----------------------------- kernel body ---------------------------------


def _sdpa_kernel(q_ref, k_ref, v_ref, out_ref, attn_ref):
    # q_ref: (G, TQ, D); k_ref/v_ref: (G, S, D); out_ref: (G, TQ, D);
    # attn_ref: (G, TQ, S).  Q arrives pre-scaled by 1/D and all inputs are
    # already in the MXU compute dtype (bf16), so the body per head is two
    # clean 2-D MXU dots plus a softmax.
    g_per_step = q_ref.shape[0]
    for g in range(g_per_step):  # static unroll; G is a small compile-time constant
        q = q_ref[g]  # (TQ, D)
        k = k_ref[g]  # (S, D)

        # scores[s, t] = sum_d q[s, d] * k[t, d]  ==  Q @ K^T, f32 accumulation.
        scores = jax.lax.dot_general(
            q,
            k,
            dimension_numbers=(((1,), (1,)), ((), ())),
            preferred_element_type=jnp.float32,
        )

        # Numerically stable softmax over the last axis; keep the live set of
        # (TQ, S) f32 temporaries minimal (scores -> e -> p).
        m = jnp.max(scores, axis=-1, keepdims=True)
        p = jnp.exp(scores - m)
        denom = jnp.sum(p, axis=-1, keepdims=True)
        p = p * pl.reciprocal(denom, approx=True)  # EUP vrcp, frees the VALU

        attn_ref[g] = p.astype(attn_ref.dtype)

        # out = P @ V, bf16 operands, f32 accumulation on the MXU.
        out_ref[g] = jnp.dot(
            p.astype(v_ref.dtype),
            v_ref[g],
            preferred_element_type=jnp.float32,
        ).astype(out_ref.dtype)


# --------------------------- tile-size selection ----------------------------


def _divisors(n: int):
    ds = set()
    i = 1
    while i * i <= n:
        if n % i == 0:
            ds.add(i)
            ds.add(n // i)
        i += 1
    return ds


def _vmem_config():
    """Returns (vmem_limit_bytes, tile_budget_bytes), generation-aware."""
    phys = 64 * 1024 * 1024  # conservative default == v7x per-TensorCore VMEM
    try:
        phys = int(pltpu.get_tpu_info().vmem_capacity_bytes)
    except Exception:
        pass
    if phys <= 64 * 1024 * 1024:
        limit = 52 * 1024 * 1024   # v7x: leave ~12 MiB headroom for compiler scratch
    else:
        limit = 104 * 1024 * 1024  # v5e / v6e: 128 MiB physical VMEM
    budget = int(limit * 0.8)      # headroom for temporaries we don't model exactly
    return limit, budget


def _vmem_use_bytes(G, TQ, S, D, q_elt, kv_elt, out_elt, attn_elt):
    kv_blocks = 2 * 2 * G * S * D * kv_elt     # K and V, double-buffered by the pipeline
    q_block = 2 * G * TQ * D * q_elt           # double-buffered Q tile
    out_block = 2 * G * TQ * D * out_elt       # double-buffered out tile
    attn_block = 2 * G * TQ * S * attn_elt     # double-buffered attn tile (dominant)
    temps = G * TQ * S * (3 * 4 + 2)           # ~3 live (TQ,S) f32 temps + bf16 copy of p
    return kv_blocks + q_block + out_block + attn_block + temps


def _choose_tiles(BH, S, D, budget, q_elt, kv_elt, out_elt, attn_elt):
    """Pick (G heads per step, TQ query-tile) under the VMEM budget."""

    def fits(G, TQ):
        return _vmem_use_bytes(G, TQ, S, D, q_elt, kv_elt, out_elt, attn_elt) <= budget

    # Small-S path: whole sequence in one q tile; batch G heads per grid step
    # to amortize the ~0.35 us fixed per-step overhead.
    if S <= 256 and fits(1, S):
        g_cap = max(1, 512 // S)
        g = 1
        for cand in sorted(_divisors(BH), reverse=True):
            if cand <= g_cap and fits(cand, S):
                g = cand
                break
        return g, S

    # Large-S path: one head per step; largest divisor-of-S q tile (<= 1024)
    # that fits the budget.  Prefer multiples of 256 (full M-dim fill on the
    # 2x256x256 MXUs of v6e/v7x), then 128 (v5e 4x128x128), then 8.
    cands = sorted(
        {t for t in _divisors(S) if t <= 1024 and (t == S or t % 8 == 0)},
        key=lambda t: (t % 256 == 0, t % 128 == 0, t),
        reverse=True,
    )
    if not cands:
        cands = [S]  # odd S with no 8-multiple divisor: single full tile (legal block)
    for t in cands:
        if fits(1, t):
            return 1, t
    return 1, min(cands)  # best effort for pathological shapes


# ------------------------------- wrapper ------------------------------------


def scaled_dot_product_attention(Q, K, V, mask=None, *, attn_dtype=None,
                                 compute_dtype=jnp.bfloat16):
    """Q, K, V: [B, H, S, D]. Returns (out [B,H,S,D], attn [B,H,S,S]).

    Matches the PyTorch module: scores divided by head dim D (not sqrt(D)).
    Matmul operands run in `compute_dtype` (bf16 by default) with f32
    accumulation; pass attn_dtype=jnp.bfloat16 to halve the dominant attn
    HBM write stream when the consumer tolerates it.
    """
    if mask is not None:
        # TODO(synk): mask (masked_fill_ with -inf) not implemented in this kernel.
        raise NotImplementedError("mask is not supported by this Pallas kernel")

    B, H, S, D = Q.shape
    BH = B * H
    out_dtype = Q.dtype
    attn_dtype = Q.dtype if attn_dtype is None else attn_dtype

    vmem_limit, budget = _vmem_config()
    G, TQ = _choose_tiles(
        BH, S, D, budget,
        q_elt=np.dtype(compute_dtype).itemsize,
        kv_elt=np.dtype(compute_dtype).itemsize,
        out_elt=np.dtype(out_dtype).itemsize,
        attn_elt=np.dtype(attn_dtype).itemsize,
    )

    # Single wrapper-side cast to the compute dtype; the 1/D scale is fused
    # into the same elementwise op (in f32) so the kernel does no per-step
    # scaling or K/V re-casting.
    q = (Q.reshape(BH, S, D) * (1.0 / D)).astype(compute_dtype)
    k = K.reshape(BH, S, D).astype(compute_dtype)
    v = V.reshape(BH, S, D).astype(compute_dtype)

    out, attn = pl.pallas_call(
        _sdpa_kernel,
        out_shape=(
            jax.ShapeDtypeStruct((BH, S, D), out_dtype),
            jax.ShapeDtypeStruct((BH, S, S), attn_dtype),
        ),
        grid_spec=pltpu.PrefetchScalarGridSpec(
            num_scalar_prefetch=0,
            grid=(BH // G, S // TQ),
            in_specs=[
                # Q tiled along the query axis (grouped over G heads).
                pl.BlockSpec((G, TQ, D), lambda i, j: (i, j, 0)),
                # K / V: index map constant in j -> VMEM-resident across q tiles.
                pl.BlockSpec((G, S, D), lambda i, j: (i, 0, 0)),
                pl.BlockSpec((G, S, D), lambda i, j: (i, 0, 0)),
            ],
            out_specs=(
                pl.BlockSpec((G, TQ, D), lambda i, j: (i, j, 0)),
                pl.BlockSpec((G, TQ, S), lambda i, j: (i, j, 0)),
            ),
        ),
        compiler_params=pltpu.CompilerParams(
            # Head axis "parallel": megacore shards heads, so the two v7x
            # TensorCores never duplicate K/V.  The q-tile axis stays
            # sequential ("arbitrary") to preserve per-head K/V residency.
            dimension_semantics=("parallel", "arbitrary"),
            vmem_limit_bytes=vmem_limit,
        ),
    )(q, k, v)

    return out.reshape(B, H, S, D), attn.reshape(B, H, S, S)


# ------------------------------ reference -----------------------------------


def _reference(Q, K, V):
    D = K.shape[-1]
    scores = jnp.einsum("bhsd,bhtd->bhst", Q, K) / jnp.float32(D)
    p = jax.nn.softmax(scores, axis=-1)
    out = jnp.einsum("bhst,bhtd->bhsd", p, V)
    return out, p


if __name__ == "__main__":
    B, H, S, D = 2, 4, 8, 32
    key = jax.random.PRNGKey(0)
    kq, kk, kv = jax.random.split(key, 3)
    Q = jax.random.normal(kq, (B, H, S, D), dtype=jnp.float32)
    K = jax.random.normal(kk, (B, H, S, D), dtype=jnp.float32)
    V = jax.random.normal(kv, (B, H, S, D), dtype=jnp.float32)

    out, attn = scaled_dot_product_attention(Q, K, V)
    jax.block_until_ready((out, attn))

    out_ref, attn_ref = _reference(Q, K, V)
    # bf16 MXU operands (f32 accumulation) + approx reciprocal -> loose tolerances.
    assert jnp.allclose(out, out_ref, atol=2e-2, rtol=2e-2), "out mismatch"
    assert jnp.allclose(attn, attn_ref, atol=2e-2, rtol=2e-2), "attn mismatch"

    print("KERNEL_OK")
</pallas_src>

<mosaic_0001>
module attributes {stable_mosaic.version = 11 : i64} {
  func.func @_sdpa_kernel(%arg0: i32, %arg1: i32, %arg2: memref<8x8x32xbf16, #tpu.memory_space<vmem>>, %arg3: memref<8x8x32xbf16, #tpu.memory_space<vmem>>, %arg4: memref<8x8x32xbf16, #tpu.memory_space<vmem>>, %arg5: memref<8x8x32xf32, #tpu.memory_space<vmem>>, %arg6: memref<8x8x8xf32, #tpu.memory_space<vmem>>) attributes {dimension_semantics = [#tpu.dimension_semantics<parallel>, #tpu.dimension_semantics<arbitrary>], iteration_bounds = array<i64: 1, 1>, scalar_prefetch = 0 : i64, scratch_operands = 0 : i64, tpu.core_type = #tpu.core_type<tc>, window_params = [{transform_indices = @transform_0, window_bounds = array<i64: 8, 8, 32>}, {transform_indices = @transform_1, window_bounds = array<i64: 8, 8, 32>}, {transform_indices = @transform_2, window_bounds = array<i64: 8, 8, 32>}, {transform_indices = @transform_3, window_bounds = array<i64: 8, 8, 32>}, {transform_indices = @transform_4, window_bounds = array<i64: 8, 8, 8>}]} {
    %c0 = arith.constant 0 : index
    %c0_0 = arith.constant 0 : index
    %c0_1 = arith.constant 0 : index
    %0 = vector.load %arg2[%c0, %c0_0, %c0_1] : memref<8x8x32xbf16, #tpu.memory_space<vmem>>, vector<1x8x32xbf16>
    %1 = vector.shape_cast %0 : vector<1x8x32xbf16> to vector<8x32xbf16>
    %c0_2 = arith.constant 0 : index
    %c0_3 = arith.constant 0 : index
    %c0_4 = arith.constant 0 : index
    %2 = vector.load %arg3[%c0_2, %c0_3, %c0_4] : memref<8x8x32xbf16, #tpu.memory_space<vmem>>, vector<1x8x32xbf16>
    %3 = vector.shape_cast %2 : vector<1x8x32xbf16> to vector<8x32xbf16>
    %cst = arith.constant dense<0.000000e+00> : vector<8x8xf32>
    %4 = tpu.matmul %1, %3, %cst {dimension_numbers = #tpu.dot_dimension_numbers<[1], [1], [0], [0], [0, 0, 1, 0], [], []>} : vector<8x32xbf16>, vector<8x32xbf16>, vector<8x8xf32> -> vector<8x8xf32>
    %cst_5 = arith.constant dense<0xFF800000> : vector<8xf32>
    %5 = vector.multi_reduction <maximumf>, %4, %cst_5 [1] : vector<8x8xf32> to vector<8xf32>
    %6 = vector.shape_cast %5 : vector<8xf32> to vector<8x1xf32>
    %7 = vector.broadcast %6 : vector<8x1xf32> to vector<8x8xf32>
    %8 = arith.subf %4, %7 : vector<8x8xf32>
    %9 = math.exp %8 : vector<8x8xf32>
    %cst_6 = arith.constant dense<0.000000e+00> : vector<8xf32>
    %10 = vector.multi_reduction <add>, %9, %cst_6 [1] : vector<8x8xf32> to vector<8xf32>
    %11 = vector.shape_cast %10 : vector<8xf32> to vector<8x1xf32>
    %12 = tpu.reciprocal %11 {approx = true} : vector<8x1xf32> -> vector<8x1xf32>
    %13 = vector.broadcast %12 : vector<8x1xf32> to vector<8x8xf32>
    %14 = arith.mulf %9, %13 : vector<8x8xf32>
    %c0_7 = arith.constant 0 : index
    %c0_8 = arith.constant 0 : index
    %c0_9 = arith.constant 0 : index
    %15 = vector.load %arg6[%c0_7, %c0_8, %c0_9] : memref<8x8x8xf32, #tpu.memory_space<vmem>>, vector<1x8x8xf32>
    %16 = vector.shape_cast %15 : vector<1x8x8xf32> to vector<8x8xf32>
    %17 = vector.shape_cast %14 : vector<8x8xf32> to vector<1x8x8xf32>
    tpu.vector_store %arg6[%c0_7, %c0_8, %c0_9], %17 {strides = array<i32>} : memref<8x8x8xf32, #tpu.memory_space<vmem>>, vector<1x8x8xf32>,
    %18 = arith.truncf %14 : vector<8x8xf32> to vector<8x8xbf16>
    %c0_10 = arith.constant 0 : index
    %c0_11 = arith.constant 0 : index
    %c0_12 = arith.constant 0 : index
    %19 = vector.load %arg4[%c0_10, %c0_11, %c0_12] : memref<8x8x32xbf16, #tpu.memory_space<vmem>>, vector<1x8x32xbf16>
    %20 = vector.shape_cast %19 : vector<1x8x32xbf16> to vector<8x32xbf16>
    %cst_13 = arith.constant dense<0.000000e+00> : vector<8x32xf32>
    %21 = tpu.matmul %18, %20, %cst_13 {dimension_numbers = #tpu.dot_dimension_numbers<[1], [0], [0], [1], [0, 0, 1, 1], [], []>} : vector<8x8xbf16>, vector<8x32xbf16>, vector<8x32xf32> -> vector<8x32xf32>
    %c0_14 = arith.constant 0 : index
    %c0_15 = arith.constant 0 : index
    %c0_16 = arith.constant 0 : index
    %22 = vector.load %arg5[%c0_14, %c0_15, %c0_16] : memref<8x8x32xf32, #tpu.memory_space<vmem>>, vector<1x8x32xf32>
    %23 = vector.shape_cast %22 : vector<1x8x32xf32> to vector<8x32xf32>
    %24 = vector.shape_cast %21 : vector<8x32xf32> to vector<1x8x32xf32>
    tpu.vector_store %arg5[%c0_14, %c0_15, %c0_16], %24 {strides = array<i32>} : memref<8x8x32xf32, #tpu.memory_space<vmem>>, vector<1x8x32xf32>,
    %c1 = arith.constant 1 : index
    %c0_17 = arith.constant 0 : index
    %c0_18 = arith.constant 0 : index
    %25 = vector.load %arg2[%c1, %c0_17, %c0_18] : memref<8x8x32xbf16, #tpu.memory_space<vmem>>, vector<1x8x32xbf16>
    %26 = vector.shape_cast %25 : vector<1x8x32xbf16> to vector<8x32xbf16>
    %c1_19 = arith.constant 1 : index
    %c0_20 = arith.constant 0 : index
    %c0_21 = arith.constant 0 : index
    %27 = vector.load %arg3[%c1_19, %c0_20, %c0_21] : memref<8x8x32xbf16, #tpu.memory_space<vmem>>, vector<1x8x32xbf16>
    %28 = vector.shape_cast %27 : vector<1x8x32xbf16> to vector<8x32xbf16>
    %cst_22 = arith.constant dense<0.000000e+00> : vector<8x8xf32>
    %29 = tpu.matmul %26, %28, %cst_22 {dimension_numbers = #tpu.dot_dimension_numbers<[1], [1], [0], [0], [0, 0, 1, 0], [], []>} : vector<8x32xbf16>, vector<8x32xbf16>, vector<8x8xf32> -> vector<8x8xf32>
    %cst_23 = arith.constant dense<0xFF800000> : vector<8xf32>
    %30 = vector.multi_reduction <maximumf>, %29, %cst_23 [1] : vector<8x8xf32> to vector<8xf32>
    %31 = vector.shape_cast %30 : vector<8xf32> to vector<8x1xf32>
    %32 = vector.broadcast %31 : vector<8x1xf32> to vector<8x8xf32>
    %33 = arith.subf %29, %32 : vector<8x8xf32>
    %34 = math.exp %33 : vector<8x8xf32>
    %cst_24 = arith.constant dense<0.000000e+00> : vector<8xf32>
    %35 = vector.multi_reduction <add>, %34, %cst_24 [1] : vector<8x8xf32> to vector<8xf32>
    %36 = vector.shape_cast %35 : vector<8xf32> to vector<8x1xf32>
    %37 = tpu.reciprocal %36 {approx = true} : vector<8x1xf32> -> vector<8x1xf32>
    %38 = vector.broadcast %37 : vector<8x1xf32> to vector<8x8xf32>
    %39 = arith.mulf %34, %38 : vector<8x8xf32>
    %c1_25 = arith.constant 1 : index
    %c0_26 = arith.constant 0 : index
    %c0_27 = arith.constant 0 : index
    %40 = vector.load %arg6[%c1_25, %c0_26, %c0_27] : memref<8x8x8xf32, #tpu.memory_space<vmem>>, vector<1x8x8xf32>
    %41 = vector.shape_cast %40 : vector<1x8x8xf32> to vector<8x8xf32>
    %42 = vector.shape_cast %39 : vector<8x8xf32> to vector<1x8x8xf32>
    tpu.vector_store %arg6[%c1_25, %c0_26, %c0_27], %42 {strides = array<i32>} : memref<8x8x8xf32, #tpu.memory_space<vmem>>, vector<1x8x8xf32>,
    %43 = arith.truncf %39 : vector<8x8xf32> to vector<8x8xbf16>
    %c1_28 = arith.constant 1 : index
    %c0_29 = arith.constant 0 : index
    %c0_30 = arith.constant 0 : index
    %44 = vector.load %arg4[%c1_28, %c0_29, %c0_30] : memref<8x8x32xbf16, #tpu.memory_space<vmem>>, vector<1x8x32xbf16>
    %45 = vector.shape_cast %44 : vector<1x8x32xbf16> to vector<8x32xbf16>
    %cst_31 = arith.constant dense<0.000000e+00> : vector<8x32xf32>
    %46 = tpu.matmul %43, %45, %cst_31 {dimension_numbers = #tpu.dot_dimension_numbers<[1], [0], [0], [1], [0, 0, 1, 1], [], []>} : vector<8x8xbf16>, vector<8x32xbf16>, vector<8x32xf32> -> vector<8x32xf32>
    %c1_32 = arith.constant 1 : index
    %c0_33 = arith.constant 0 : index
    %c0_34 = arith.constant 0 : index
    %47 = vector.load %arg5[%c1_32, %c0_33, %c0_34] : memref<8x8x32xf32, #tpu.memory_space<vmem>>, vector<1x8x32xf32>
    %48 = vector.shape_cast %47 : vector<1x8x32xf32> to vector<8x32xf32>
    %49 = vector.shape_cast %46 : vector<8x32xf32> to vector<1x8x32xf32>
    tpu.vector_store %arg5[%c1_32, %c0_33, %c0_34], %49 {strides = array<i32>} : memref<8x8x32xf32, #tpu.memory_space<vmem>>, vector<1x8x32xf32>,
    %c2 = arith.constant 2 : index
    %c0_35 = arith.constant 0 : index
    %c0_36 = arith.constant 0 : index
    %50 = vector.load %arg2[%c2, %c0_35, %c0_36] : memref<8x8x32xbf16, #tpu.memory_space<vmem>>, vector<1x8x32xbf16>
    %51 = vector.shape_cast %50 : vector<1x8x32xbf16> to vector<8x32xbf16>
    %c2_37 = arith.constant 2 : index
    %c0_38 = arith.constant 0 : index
    %c0_39 = arith.constant 0 : index
    %52 = vector.load %arg3[%c2_37, %c0_38, %c0_39] : memref<8x8x32xbf16, #tpu.memory_space<vmem>>, vector<1x8x32xbf16>
    %53 = vector.shape_cast %52 : vector<1x8x32xbf16> to vector<8x32xbf16>
    %cst_40 = arith.constant dense<0.000000e+00> : vector<8x8xf32>
    %54 = tpu.matmul %51, %53, %cst_40 {dimension_numbers = #tpu.dot_dimension_numbers<[1], [1], [0], [0], [0, 0, 1, 0], [], []>} : vector<8x32xbf16>, vector<8x32xbf16>, vector<8x8xf32> -> vector<8x8xf32>
    %cst_41 = arith.constant dense<0xFF800000> : vector<8xf32>
    %55 = vector.multi_reduction <maximumf>, %54, %cst_41 [1] : vector<8x8xf32> to vector<8xf32>
    %56 = vector.shape_cast %55 : vector<8xf32> to vector<8x1xf32>
    %57 = vector.broadcast %56 : vector<8x1xf32> to vector<8x8xf32>
    %58 = arith.subf %54, %57 : vector<8x8xf32>
    %59 = math.exp %58 : vector<8x8xf32>
    %cst_42 = arith.constant dense<0.000000e+00> : vector<8xf32>
    %60 = vector.multi_reduction <add>, %59, %cst_42 [1] : vector<8x8xf32> to vector<8xf32>
    %61 = vector.shape_cast %60 : vector<8xf32> to vector<8x1xf32>
    %62 = tpu.reciprocal %61 {approx = true} : vector<8x1xf32> -> vector<8x1xf32>
    %63 = vector.broadcast %62 : vector<8x1xf32> to vector<8x8xf32>
    %64 = arith.mulf %59, %63 : vector<8x8xf32>
    %c2_43 = arith.constant 2 : index
    %c0_44 = arith.constant 0 : index
    %c0_45 = arith.constant 0 : index
    %65 = vector.load %arg6[%c2_43, %c0_44, %c0_45] : memref<8x8x8xf32, #tpu.memory_space<vmem>>, vector<1x8x8xf32>
    %66 = vector.shape_cast %65 : vector<1x8x8xf32> to vector<8x8xf32>
    %67 = vector.shape_cast %64 : vector<8x8xf32> to vector<1x8x8xf32>
    tpu.vector_store %arg6[%c2_43, %c0_44, %c0_45], %67 {strides = array<i32>} : memref<8x8x8xf32, #tpu.memory_space<vmem>>, vector<1x8x8xf32>,
    %68 = arith.truncf %64 : vector<8x8xf32> to vector<8x8xbf16>
    %c2_46 = arith.constant 2 : index
    %c0_47 = arith.constant 0 : index
    %c0_48 = arith.constant 0 : index
    %69 = vector.load %arg4[%c2_46, %c0_47, %c0_48] : memref<8x8x32xbf16, #tpu.memory_space<vmem>>, vector<1x8x32xbf16>
    %70 = vector.shape_cast %69 : vector<1x8x32xbf16> to vector<8x32xbf16>
    %cst_49 = arith.constant dense<0.000000e+00> : vector<8x32xf32>
    %71 = tpu.matmul %68, %70, %cst_49 {dimension_numbers = #tpu.dot_dimension_numbers<[1], [0], [0], [1], [0, 0, 1, 1], [], []>} : vector<8x8xbf16>, vector<8x32xbf16>, vector<8x32xf32> -> vector<8x32xf32>
    %c2_50 = arith.constant 2 : index
    %c0_51 = arith.constant 0 : index
    %c0_52 = arith.constant 0 : index
    %72 = vector.load %arg5[%c2_50, %c0_51, %c0_52] : memref<8x8x32xf32, #tpu.memory_space<vmem>>, vector<1x8x32xf32>
    %73 = vector.shape_cast %72 : vector<1x8x32xf32> to vector<8x32xf32>
    %74 = vector.shape_cast %71 : vector<8x32xf32> to vector<1x8x32xf32>
    tpu.vector_store %arg5[%c2_50, %c0_51, %c0_52], %74 {strides = array<i32>} : memref<8x8x32xf32, #tpu.memory_space<vmem>>, vector<1x8x32xf32>,
    %c3 = arith.constant 3 : index
    %c0_53 = arith.constant 0 : index
    %c0_54 = arith.constant 0 : index
    %75 = vector.load %arg2[%c3, %c0_53, %c0_54] : memref<8x8x32xbf16, #tpu.memory_space<vmem>>, vector<1x8x32xbf16>
    %76 = vector.shape_cast %75 : vector<1x8x32xbf16> to vector<8x32xbf16>
    %c3_55 = arith.constant 3 : index
    %c0_56 = arith.constant 0 : index
    %c0_57 = arith.constant 0 : index
    %77 = vector.load %arg3[%c3_55, %c0_56, %c0_57] : memref<8x8x32xbf16, #tpu.memory_space<vmem>>, vector<1x8x32xbf16>
    %78 = vector.shape_cast %77 : vector<1x8x32xbf16> to vector<8x32xbf16>
    %cst_58 = arith.constant dense<0.000000e+00> : vector<8x8xf32>
    %79 = tpu.matmul %76, %78, %cst_58 {dimension_numbers = #tpu.dot_dimension_numbers<[1], [1], [0], [0], [0, 0, 1, 0], [], []>} : vector<8x32xbf16>, vector<8x32xbf16>, vector<8x8xf32> -> vector<8x8xf32>
    %cst_59 = arith.constant dense<0xFF800000> : vector<8xf32>
    %80 = vector.multi_reduction <maximumf>, %79, %cst_59 [1] : vector<8x8xf32> to vector<8xf32>
    %81 = vector.shape_cast %80 : vector<8xf32> to vector<8x1xf32>
    %82 = vector.broadcast %81 : vector<8x1xf32> to vector<8x8xf32>
    %83 = arith.subf %79, %82 : vector<8x8xf32>
    %84 = math.exp %83 : vector<8x8xf32>
    %cst_60 = arith.constant dense<0.000000e+00> : vector<8xf32>
    %85 = vector.multi_reduction <add>, %84, %cst_60 [1] : vector<8x8xf32> to vector<8xf32>
    %86 = vector.shape_cast %85 : vector<8xf32> to vector<8x1xf32>
    %87 = tpu.reciprocal %86 {approx = true} : vector<8x1xf32> -> vector<8x1xf32>
    %88 = vector.broadcast %87 : vector<8x1xf32> to vector<8x8xf32>
    %89 = arith.mulf %84, %88 : vector<8x8xf32>
    %c3_61 = arith.constant 3 : index
    %c0_62 = arith.constant 0 : index
    %c0_63 = arith.constant 0 : index
    %90 = vector.load %arg6[%c3_61, %c0_62, %c0_63] : memref<8x8x8xf32, #tpu.memory_space<vmem>>, vector<1x8x8xf32>
    %91 = vector.shape_cast %90 : vector<1x8x8xf32> to vector<8x8xf32>
    %92 = vector.shape_cast %89 : vector<8x8xf32> to vector<1x8x8xf32>
    tpu.vector_store %arg6[%c3_61, %c0_62, %c0_63], %92 {strides = array<i32>} : memref<8x8x8xf32, #tpu.memory_space<vmem>>, vector<1x8x8xf32>,
    %93 = arith.truncf %89 : vector<8x8xf32> to vector<8x8xbf16>
    %c3_64 = arith.constant 3 : index
    %c0_65 = arith.constant 0 : index
    %c0_66 = arith.constant 0 : index
    %94 = vector.load %arg4[%c3_64, %c0_65, %c0_66] : memref<8x8x32xbf16, #tpu.memory_space<vmem>>, vector<1x8x32xbf16>
    %95 = vector.shape_cast %94 : vector<1x8x32xbf16> to vector<8x32xbf16>
    %cst_67 = arith.constant dense<0.000000e+00> : vector<8x32xf32>
    %96 = tpu.matmul %93, %95, %cst_67 {dimension_numbers = #tpu.dot_dimension_numbers<[1], [0], [0], [1], [0, 0, 1, 1], [], []>} : vector<8x8xbf16>, vector<8x32xbf16>, vector<8x32xf32> -> vector<8x32xf32>
    %c3_68 = arith.constant 3 : index
    %c0_69 = arith.constant 0 : index
    %c0_70 = arith.constant 0 : index
    %97 = vector.load %arg5[%c3_68, %c0_69, %c0_70] : memref<8x8x32xf32, #tpu.memory_space<vmem>>, vector<1x8x32xf32>
    %98 = vector.shape_cast %97 : vector<1x8x32xf32> to vector<8x32xf32>
    %99 = vector.shape_cast %96 : vector<8x32xf32> to vector<1x8x32xf32>
    tpu.vector_store %arg5[%c3_68, %c0_69, %c0_70], %99 {strides = array<i32>} : memref<8x8x32xf32, #tpu.memory_space<vmem>>, vector<1x8x32xf32>,
    %c4 = arith.constant 4 : index
    %c0_71 = arith.constant 0 : index
    %c0_72 = arith.constant 0 : index
    %100 = vector.load %arg2[%c4, %c0_71, %c0_72] : memref<8x8x32xbf16, #tpu.memory_space<vmem>>, vector<1x8x32xbf16>
    %101 = vector.shape_cast %100 : vector<1x8x32xbf16> to vector<8x32xbf16>
    %c4_73 = arith.constant 4 : index
    %c0_74 = arith.constant 0 : index
    %c0_75 = arith.constant 0 : index
    %102 = vector.load %arg3[%c4_73, %c0_74, %c0_75] : memref<8x8x32xbf16, #tpu.memory_space<vmem>>, vector<1x8x32xbf16>
    %103 = vector.shape_cast %102 : vector<1x8x32xbf16> to vector<8x32xbf16>
    %cst_76 = arith.constant dense<0.000000e+00> : vector<8x8xf32>
    %104 = tpu.matmul %101, %103, %cst_76 {dimension_numbers = #tpu.dot_dimension_numbers<[1], [1], [0], [0], [0, 0, 1, 0], [], []>} : vector<8x32xbf16>, vector<8x32xbf16>, vector<8x8xf32> -> vector<8x8xf32>
    %cst_77 = arith.constant dense<0xFF800000> : vector<8xf32>
    %105 = vector.multi_reduction <maximumf>, %104, %cst_77 [1] : vector<8x8xf32> to vector<8xf32>
    %106 = vector.shape_cast %105 : vector<8xf32> to vector<8x1xf32>
    %107 = vector.broadcast %106 : vector<8x1xf32> to vector<8x8xf32>
    %108 = arith.subf %104, %107 : vector<8x8xf32>
    %109 = math.exp %108 : vector<8x8xf32>
    %cst_78 = arith.constant dense<0.000000e+00> : vector<8xf32>
    %110 = vector.multi_reduction <add>, %109, %cst_78 [1] : vector<8x8xf32> to vector<8xf32>
    %111 = vector.shape_cast %110 : vector<8xf32> to vector<8x1xf32>
    %112 = tpu.reciprocal %111 {approx = true} : vector<8x1xf32> -> vector<8x1xf32>
    %113 = vector.broadcast %112 : vector<8x1xf32> to vector<8x8xf32>
    %114 = arith.mulf %109, %113 : vector<8x8xf32>
    %c4_79 = arith.constant 4 : index
    %c0_80 = arith.constant 0 : index
    %c0_81 = arith.constant 0 : index
    %115 = vector.load %arg6[%c4_79, %c0_80, %c0_81] : memref<8x8x8xf32, #tpu.memory_space<vmem>>, vector<1x8x8xf32>
    %116 = vector.shape_cast %115 : vector<1x8x8xf32> to vector<8x8xf32>
    %117 = vector.shape_cast %114 : vector<8x8xf32> to vector<1x8x8xf32>
    tpu.vector_store %arg6[%c4_79, %c0_80, %c0_81], %117 {strides = array<i32>} : memref<8x8x8xf32, #tpu.memory_space<vmem>>, vector<1x8x8xf32>,
    %118 = arith.truncf %114 : vector<8x8xf32> to vector<8x8xbf16>
    %c4_82 = arith.constant 4 : index
    %c0_83 = arith.constant 0 : index
    %c0_84 = arith.constant 0 : index
    %119 = vector.load %arg4[%c4_82, %c0_83, %c0_84] : memref<8x8x32xbf16, #tpu.memory_space<vmem>>, vector<1x8x32xbf16>
    %120 = vector.shape_cast %119 : vector<1x8x32xbf16> to vector<8x32xbf16>
    %cst_85 = arith.constant dense<0.000000e+00> : vector<8x32xf32>
    %121 = tpu.matmul %118, %120, %cst_85 {dimension_numbers = #tpu.dot_dimension_numbers<[1], [0], [0], [1], [0, 0, 1, 1], [], []>} : vector<8x8xbf16>, vector<8x32xbf16>, vector<8x32xf32> -> vector<8x32xf32>
    %c4_86 = arith.constant 4 : index
    %c0_87 = arith.constant 0 : index
    %c0_88 = arith.constant 0 : index
    %122 = vector.load %arg5[%c4_86, %c0_87, %c0_88] : memref<8x8x32xf32, #tpu.memory_space<vmem>>, vector<1x8x32xf32>
    %123 = vector.shape_cast %122 : vector<1x8x32xf32> to vector<8x32xf32>
    %124 = vector.shape_cast %121 : vector<8x32xf32> to vector<1x8x32xf32>
    tpu.vector_store %arg5[%c4_86, %c0_87, %c0_88], %124 {strides = array<i32>} : memref<8x8x32xf32, #tpu.memory_space<vmem>>, vector<1x8x32xf32>,
    %c5 = arith.constant 5 : index
    %c0_89 = arith.constant 0 : index
    %c0_90 = arith.constant 0 : index
    %125 = vector.load %arg2[%c5, %c0_89, %c0_90] : memref<8x8x32xbf16, #tpu.memory_space<vmem>>, vector<1x8x32xbf16>
    %126 = vector.shape_cast %125 : vector<1x8x32xbf16> to vector<8x32xbf16>
    %c5_91 = arith.constant 5 : index
    %c0_92 = arith.constant 0 : index
    %c0_93 = arith.constant 0 : index
    %127 = vector.load %arg3[%c5_91, %c0_92, %c0_93] : memref<8x8x32xbf16, #tpu.memory_space<vmem>>, vector<1x8x32xbf16>
    %128 = vector.shape_cast %127 : vector<1x8x32xbf16> to vector<8x32xbf16>
    %cst_94 = arith.constant dense<0.000000e+00> : vector<8x8xf32>
    %129 = tpu.matmul %126, %128, %cst_94 {dimension_numbers = #tpu.dot_dimension_numbers<[1], [1], [0], [0], [0, 0, 1, 0], [], []>} : vector<8x32xbf16>, vector<8x32xbf16>, vector<8x8xf32> -> vector<8x8xf32>
    %cst_95 = arith.constant dense<0xFF800000> : vector<8xf32>
    %130 = vector.multi_reduction <maximumf>, %129, %cst_95 [1] : vector<8x8xf32> to vector<8xf32>
    %131 = vector.shape_cast %130 : vector<8xf32> to vector<8x1xf32>
    %132 = vector.broadcast %131 : vector<8x1xf32> to vector<8x8xf32>
    %133 = arith.subf %129, %132 : vector<8x8xf32>
    %134 = math.exp %133 : vector<8x8xf32>
    %cst_96 = arith.constant dense<0.000000e+00> : vector<8xf32>
    %135 = vector.multi_reduction <add>, %134, %cst_96 [1] : vector<8x8xf32> to vector<8xf32>
    %136 = vector.shape_cast %135 : vector<8xf32> to vector<8x1xf32>
    %137 = tpu.reciprocal %136 {approx = true} : vector<8x1xf32> -> vector<8x1xf32>
    %138 = vector.broadcast %137 : vector<8x1xf32> to vector<8x8xf32>
    %139 = arith.mulf %134, %138 : vector<8x8xf32>
    %c5_97 = arith.constant 5 : index
    %c0_98 = arith.constant 0 : index
    %c0_99 = arith.constant 0 : index
    %140 = vector.load %arg6[%c5_97, %c0_98, %c0_99] : memref<8x8x8xf32, #tpu.memory_space<vmem>>, vector<1x8x8xf32>
    %141 = vector.shape_cast %140 : vector<1x8x8xf32> to vector<8x8xf32>
    %142 = vector.shape_cast %139 : vector<8x8xf32> to vector<1x8x8xf32>
    tpu.vector_store %arg6[%c5_97, %c0_98, %c0_99], %142 {strides = array<i32>} : memref<8x8x8xf32, #tpu.memory_space<vmem>>, vector<1x8x8xf32>,
    %143 = arith.truncf %139 : vector<8x8xf32> to vector<8x8xbf16>
    %c5_100 = arith.constant 5 : index
    %c0_101 = arith.constant 0 : index
    %c0_102 = arith.constant 0 : index
    %144 = vector.load %arg4[%c5_100, %c0_101, %c0_102] : memref<8x8x32xbf16, #tpu.memory_space<vmem>>, vector<1x8x32xbf16>
    %145 = vector.shape_cast %144 : vector<1x8x32xbf16> to vector<8x32xbf16>
    %cst_103 = arith.constant dense<0.000000e+00> : vector<8x32xf32>
    %146 = tpu.matmul %143, %145, %cst_103 {dimension_numbers = #tpu.dot_dimension_numbers<[1], [0], [0], [1], [0, 0, 1, 1], [], []>} : vector<8x8xbf16>, vector<8x32xbf16>, vector<8x32xf32> -> vector<8x32xf32>
    %c5_104 = arith.constant 5 : index
    %c0_105 = arith.constant 0 : index
    %c0_106 = arith.constant 0 : index
    %147 = vector.load %arg5[%c5_104, %c0_105, %c0_106] : memref<8x8x32xf32, #tpu.memory_space<vmem>>, vector<1x8x32xf32>
    %148 = vector.shape_cast %147 : vector<1x8x32xf32> to vector<8x32xf32>
    %149 = vector.shape_cast %146 : vector<8x32xf32> to vector<1x8x32xf32>
    tpu.vector_store %arg5[%c5_104, %c0_105, %c0_106], %149 {strides = array<i32>} : memref<8x8x32xf32, #tpu.memory_space<vmem>>, vector<1x8x32xf32>,
    %c6 = arith.constant 6 : index
    %c0_107 = arith.constant 0 : index
    %c0_108 = arith.constant 0 : index
    %150 = vector.load %arg2[%c6, %c0_107, %c0_108] : memref<8x8x32xbf16, #tpu.memory_space<vmem>>, vector<1x8x32xbf16>
    %151 = vector.shape_cast %150 : vector<1x8x32xbf16> to vector<8x32xbf16>
    %c6_109 = arith.constant 6 : index
    %c0_110 = arith.constant 0 : index
    %c0_111 = arith.constant 0 : index
    %152 = vector.load %arg3[%c6_109, %c0_110, %c0_111] : memref<8x8x32xbf16, #tpu.memory_space<vmem>>, vector<1x8x32xbf16>
    %153 = vector.shape_cast %152 : vector<1x8x32xbf16> to vector<8x32xbf16>
    %cst_112 = arith.constant dense<0.000000e+00> : vector<8x8xf32>
    %154 = tpu.matmul %151, %153, %cst_112 {dimension_numbers = #tpu.dot_dimension_numbers<[1], [1], [0], [0], [0, 0, 1, 0], [], []>} : vector<8x32xbf16>, vector<8x32xbf16>, vector<8x8xf32> -> vector<8x8xf32>
    %cst_113 = arith.constant dense<0xFF800000> : vector<8xf32>
    %155 = vector.multi_reduction <maximumf>, %154, %cst_113 [1] : vector<8x8xf32> to vector<8xf32>
    %156 = vector.shape_cast %155 : vector<8xf32> to vector<8x1xf32>
    %157 = vector.broadcast %156 : vector<8x1xf32> to vector<8x8xf32>
    %158 = arith.subf %154, %157 : vector<8x8xf32>
    %159 = math.exp %158 : vector<8x8xf32>
    %cst_114 = arith.constant dense<0.000000e+00> : vector<8xf32>
    %160 = vector.multi_reduction <add>, %159, %cst_114 [1] : vector<8x8xf32> to vector<8xf32>
    %161 = vector.shape_cast %160 : vector<8xf32> to vector<8x1xf32>
    %162 = tpu.reciprocal %161 {approx = true} : vector<8x1xf32> -> vector<8x1xf32>
    %163 = vector.broadcast %162 : vector<8x1xf32> to vector<8x8xf32>
    %164 = arith.mulf %159, %163 : vector<8x8xf32>
    %c6_115 = arith.constant 6 : index
    %c0_116 = arith.constant 0 : index
    %c0_117 = arith.constant 0 : index
    %165 = vector.load %arg6[%c6_115, %c0_116, %c0_117] : memref<8x8x8xf32, #tpu.memory_space<vmem>>, vector<1x8x8xf32>
    %166 = vector.shape_cast %165 : vector<1x8x8xf32> to vector<8x8xf32>
    %167 = vector.shape_cast %164 : vector<8x8xf32> to vector<1x8x8xf32>
    tpu.vector_store %arg6[%c6_115, %c0_116, %c0_117], %167 {strides = array<i32>} : memref<8x8x8xf32, #tpu.memory_space<vmem>>, vector<1x8x8xf32>,
    %168 = arith.truncf %164 : vector<8x8xf32> to vector<8x8xbf16>
    %c6_118 = arith.constant 6 : index
    %c0_119 = arith.constant 0 : index
    %c0_120 = arith.constant 0 : index
    %169 = vector.load %arg4[%c6_118, %c0_119, %c0_120] : memref<8x8x32xbf16, #tpu.memory_space<vmem>>, vector<1x8x32xbf16>
    %170 = vector.shape_cast %169 : vector<1x8x32xbf16> to vector<8x32xbf16>
    %cst_121 = arith.constant dense<0.000000e+00> : vector<8x32xf32>
    %171 = tpu.matmul %168, %170, %cst_121 {dimension_numbers = #tpu.dot_dimension_numbers<[1], [0], [0], [1], [0, 0, 1, 1], [], []>} : vector<8x8xbf16>, vector<8x32xbf16>, vector<8x32xf32> -> vector<8x32xf32>
    %c6_122 = arith.constant 6 : index
    %c0_123 = arith.constant 0 : index
    %c0_124 = arith.constant 0 : index
    %172 = vector.load %arg5[%c6_122, %c0_123, %c0_124] : memref<8x8x32xf32, #tpu.memory_space<vmem>>, vector<1x8x32xf32>
    %173 = vector.shape_cast %172 : vector<1x8x32xf32> to vector<8x32xf32>
    %174 = vector.shape_cast %171 : vector<8x32xf32> to vector<1x8x32xf32>
    tpu.vector_store %arg5[%c6_122, %c0_123, %c0_124], %174 {strides = array<i32>} : memref<8x8x32xf32, #tpu.memory_space<vmem>>, vector<1x8x32xf32>,
    %c7 = arith.constant 7 : index
    %c0_125 = arith.constant 0 : index
    %c0_126 = arith.constant 0 : index
    %175 = vector.load %arg2[%c7, %c0_125, %c0_126] : memref<8x8x32xbf16, #tpu.memory_space<vmem>>, vector<1x8x32xbf16>
    %176 = vector.shape_cast %175 : vector<1x8x32xbf16> to vector<8x32xbf16>
    %c7_127 = arith.constant 7 : index
    %c0_128 = arith.constant 0 : index
    %c0_129 = arith.constant 0 : index
    %177 = vector.load %arg3[%c7_127, %c0_128, %c0_129] : memref<8x8x32xbf16, #tpu.memory_space<vmem>>, vector<1x8x32xbf16>
    %178 = vector.shape_cast %177 : vector<1x8x32xbf16> to vector<8x32xbf16>
    %cst_130 = arith.constant dense<0.000000e+00> : vector<8x8xf32>
    %179 = tpu.matmul %176, %178, %cst_130 {dimension_numbers = #tpu.dot_dimension_numbers<[1], [1], [0], [0], [0, 0, 1, 0], [], []>} : vector<8x32xbf16>, vector<8x32xbf16>, vector<8x8xf32> -> vector<8x8xf32>
    %cst_131 = arith.constant dense<0xFF800000> : vector<8xf32>
    %180 = vector.multi_reduction <maximumf>, %179, %cst_131 [1] : vector<8x8xf32> to vector<8xf32>
    %181 = vector.shape_cast %180 : vector<8xf32> to vector<8x1xf32>
    %182 = vector.broadcast %181 : vector<8x1xf32> to vector<8x8xf32>
    %183 = arith.subf %179, %182 : vector<8x8xf32>
    %184 = math.exp %183 : vector<8x8xf32>
    %cst_132 = arith.constant dense<0.000000e+00> : vector<8xf32>
    %185 = vector.multi_reduction <add>, %184, %cst_132 [1] : vector<8x8xf32> to vector<8xf32>
    %186 = vector.shape_cast %185 : vector<8xf32> to vector<8x1xf32>
    %187 = tpu.reciprocal %186 {approx = true} : vector<8x1xf32> -> vector<8x1xf32>
    %188 = vector.broadcast %187 : vector<8x1xf32> to vector<8x8xf32>
    %189 = arith.mulf %184, %188 : vector<8x8xf32>
    %c7_133 = arith.constant 7 : index
    %c0_134 = arith.constant 0 : index
    %c0_135 = arith.constant 0 : index
    %190 = vector.load %arg6[%c7_133, %c0_134, %c0_135] : memref<8x8x8xf32, #tpu.memory_space<vmem>>, vector<1x8x8xf32>
    %191 = vector.shape_cast %190 : vector<1x8x8xf32> to vector<8x8xf32>
    %192 = vector.shape_cast %189 : vector<8x8xf32> to vector<1x8x8xf32>
    tpu.vector_store %arg6[%c7_133, %c0_134, %c0_135], %192 {strides = array<i32>} : memref<8x8x8xf32, #tpu.memory_space<vmem>>, vector<1x8x8xf32>,
    %193 = arith.truncf %189 : vector<8x8xf32> to vector<8x8xbf16>
    %c7_136 = arith.constant 7 : index
    %c0_137 = arith.constant 0 : index
    %c0_138 = arith.constant 0 : index
    %194 = vector.load %arg4[%c7_136, %c0_137, %c0_138] : memref<8x8x32xbf16, #tpu.memory_space<vmem>>, vector<1x8x32xbf16>
    %195 = vector.shape_cast %194 : vector<1x8x32xbf16> to vector<8x32xbf16>
    %cst_139 = arith.constant dense<0.000000e+00> : vector<8x32xf32>
    %196 = tpu.matmul %193, %195, %cst_139 {dimension_numbers = #tpu.dot_dimension_numbers<[1], [0], [0], [1], [0, 0, 1, 1], [], []>} : vector<8x8xbf16>, vector<8x32xbf16>, vector<8x32xf32> -> vector<8x32xf32>
    %c7_140 = arith.constant 7 : index
    %c0_141 = arith.constant 0 : index
    %c0_142 = arith.constant 0 : index
    %197 = vector.load %arg5[%c7_140, %c0_141, %c0_142] : memref<8x8x32xf32, #tpu.memory_space<vmem>>, vector<1x8x32xf32>
    %198 = vector.shape_cast %197 : vector<1x8x32xf32> to vector<8x32xf32>
    %199 = vector.shape_cast %196 : vector<8x32xf32> to vector<1x8x32xf32>
    tpu.vector_store %arg5[%c7_140, %c0_141, %c0_142], %199 {strides = array<i32>} : memref<8x8x32xf32, #tpu.memory_space<vmem>>, vector<1x8x32xf32>,
    return
  }
  func.func @transform_0(%arg0: i32, %arg1: i32) -> (i32, i32, i32) {
    %c0_i32 = arith.constant 0 : i32
    %c0_i32_0 = arith.constant 0 : i32
    return %arg0, %arg1, %c0_i32 : i32, i32, i32
  }
  func.func @transform_1(%arg0: i32, %arg1: i32) -> (i32, i32, i32) {
    %c0_i32 = arith.constant 0 : i32
    %c0_i32_0 = arith.constant 0 : i32
    %c0_i32_1 = arith.constant 0 : i32
    return %arg0, %c0_i32, %c0_i32_0 : i32, i32, i32
  }
  func.func @transform_2(%arg0: i32, %arg1: i32) -> (i32, i32, i32) {
    %c0_i32 = arith.constant 0 : i32
    %c0_i32_0 = arith.constant 0 : i32
    %c0_i32_1 = arith.constant 0 : i32
    return %arg0, %c0_i32, %c0_i32_0 : i32, i32, i32
  }
  func.func @transform_3(%arg0: i32, %arg1: i32) -> (i32, i32, i32) {
    %c0_i32 = arith.constant 0 : i32
    %c0_i32_0 = arith.constant 0 : i32
    return %arg0, %arg1, %c0_i32 : i32, i32, i32
  }
  func.func @transform_4(%arg0: i32, %arg1: i32) -> (i32, i32, i32) {
    %c0_i32 = arith.constant 0 : i32
    %c0_i32_0 = arith.constant 0 : i32
    return %arg0, %arg1, %c0_i32 : i32, i32, i32
  }
}

</mosaic_0001>

<bundles_post_ra>
// kernel: tpu_custom_call.1
= control target key start
LH: loop header
LB: loop body
LE: loop exit
PB: predicated region body
PF: predicated region fallthrough
CT: control target
= control target key end

     0   :  { %10 = vsyncpa [#allocation3], 0  ;;  %s888_s0 = inlined_call_operand.hbm [shape: bf16[8,8,32], index: 0, kind: input, shape index: {}]   ;;  %s889_s1 = inlined_call_operand.hbm [shape: bf16[8,8,32], index: 1, kind: input, shape index: {}]   ;;  %s890_s2 = inlined_call_operand.hbm [shape: bf16[8,8,32], index: 2, kind: input, shape index: {}]   ;;  %s891_s3 = inlined_call_operand.hbm [shape: f32[8,8,32], index: 3, kind: output, shape index: {0}]   ;;  %s892_s4 = inlined_call_operand.hbm [shape: f32[8,8,8], index: 4, kind: output, shape index: {1}]  }
   0x1   :  { %11 = vsyncpa [#allocation6], 0 }
   0x2   :  { %12 = vsyncpa [#allocation4], 0 }
   0x3   :  { %13 = vsyncpa [#allocation10], 0  ;;  %s31_s17 = sshll.u32 %s889_s1, 4  ;;  %s767_s18 = smov [#allocation5]   ;;  %s32_s17 = int_to_ptr.hbm [resolvable:$true] %s31_s17 }
   0x4   :  { %s33_s19 = sshll.u32 %s767_s18, 4  ;;  %s18_s22 = sshll.u32 %s888_s0, 4  ;;  %s34_s19 = int_to_ptr.vmem [resolvable:$true] %s33_s19  ;;  %s19_s22 = int_to_ptr.hbm [resolvable:$true] %s18_s22 }
   0x5   :  { %s768_s23 = smov 64   ;;  %s769_s24 = smov 4  }
   0x6   :  { %39 = dma.hbm_to_vmem [thread:$0]  %s32_s17, 512, %s34_s19, [#allocation6], %s768_s23, %s768_s23, %s769_s24  }
   0x7   :  { %s770_s25 = smov [#allocation2]   ;;  %s44_s29 = sshll.u32 %s890_s2, 4  ;;  %s45_s29 = int_to_ptr.hbm [resolvable:$true] %s44_s29 }
   0x8   :  { %s20_s26 = sshll.u32 %s770_s25, 4  ;;  %s771_s1 = smov [#allocation7]   ;;  %s21_s26 = int_to_ptr.vmem [resolvable:$true] %s20_s26 }
   0x9   :  { %26 = dma.hbm_to_vmem [thread:$0]  %s19_s22, 512, %s21_s26, [#allocation3], %s768_s23, %s768_s23, %s769_s24  }
   0xa   :  { %s46_s30 = sshll.u32 %s771_s1, 4  ;;  %s47_s30 = int_to_ptr.vmem [resolvable:$true] %s46_s30 }
   0xb   :  { %52 = dma.hbm_to_vmem [thread:$0]  %s45_s29, 512, %s47_s30, [#allocation6], %s768_s23, %s768_s23, %s769_s24  }
   0xc   :  { %759 = dma.done.wait [#allocation3], 512  }
   0xd   :  { %760 = vsyncadd [#allocation3], 4294966784 }
   0xe   :  { %761 = dma.done.wait [#allocation6], 1024  }
   0xf   :  { %762 = vsyncadd [#allocation6], 4294966272  ;;  %vm68_vm0 = vcmask 261120   ;;  %v67_v0 = vld [vmem:[#allocation5] sm:$0xf]  ;;  %vm88_vm1 = vcmask 64512  }
  0x10   :  { %v127_v1 = vld [vmem:[#allocation5 + $0x4] sm:$0xf]  ;;  %v73_v2 = vsel %vm68_vm0, %v67_v0, 0  ;;  %v66_v4 = vld [vmem:[#allocation2] sm:$0xf]  ;;  %vm106_vm2 = vcmask 1043456  }
  0x11   :  { %v132_v3 = vsel %vm68_vm0, %v127_v1, 0  ;;  %82 = vmatpush.bf16.xpose.msra.mxu0 %v73_v2  ;;  %v125_v5 = vld [vmem:[#allocation2 + $0x4] sm:$0xf]  ;;  %v247_v6 = vld [vmem:[#allocation5 + $0xc] sm:$0xf]  ;;  %s772_s0 = smov [#allocation9]  }
  0x12   :  { %141 = vmatpush.bf16.xpose.msra.mxu2 %v132_v3  ;;  %v252_v7 = vsel %vm68_vm0, %v247_v6, 0  ;;  %v245_v8 = vld [vmem:[#allocation2 + $0xc] sm:$0xf]  ;;  %v367_v12 = vld [vmem:[#allocation5 + $0x14] sm:$0xf]  ;;  %s561_s2 = sshll.u32 %s772_s0, 4  ;;  %s562_s2 = int_to_ptr.vmem [resolvable:$true] %s561_s2 }
  0x13   :  { %v372_v13 = vsel %vm68_vm0, %v367_v12, 0  ;;  %v365_v14 = vld [vmem:[#allocation2 + $0x14] sm:$0xf]  ;;  %v102_v25 = vld [vmem:[#allocation7] sm:$0xf]  ;;  %s563_s7 = sshll.u32 %s892_s4, 4  ;;  %s564_s7 = int_to_ptr.hbm [resolvable:$true] %s563_s7 }
  0x14   :  { %v108_v26 = vsel %vm106_vm2, %v102_v25, 0  ;;  %v187_v32 = vld [vmem:[#allocation5 + $0x8] sm:$0xf]  ;;  %v307_v40 = vld [vmem:[#allocation5 + $0x10] sm:$0xf]  ;;  %s773_s8 = smov 128  }
  0x15   :  { %117 = vmatpush.bf16.msra.mxu1 %v108_v26  ;;  %v192_v33 = vsel %vm68_vm0, %v187_v32, 0  ;;  %v312_v43 = vsel %vm68_vm0, %v307_v40, 0  ;;  %v487_v44 = vld [vmem:[#allocation5 + $0x1c] sm:$0xf]  ;;  %v427_v47 = vld [vmem:[#allocation5 + $0x18] sm:$0xf] }
  0x16   :  { %v492_v45 = vsel %vm68_vm0, %v487_v44, 0  ;;  %v485_v46 = vld [vmem:[#allocation2 + $0x1c] sm:$0xf]  ;;  %v185_v48 = vld [vmem:[#allocation2 + $0x8] sm:$0xf]  ;;  %v432_v49 = vsel %vm68_vm0, %v427_v47, 0 }
  0x17   :  { %v305_v50 = vld [vmem:[#allocation2 + $0x10] sm:$0xf]  ;;  %v425_v51 = vld [vmem:[#allocation2 + $0x18] sm:$0xf]  ;;  %v162_v54 = vld [vmem:[#allocation7 + $0x4] sm:$0xf] }
  0x18   :  { %582 = vmatmul.msk.bf16.vlgmr.msra.gmra.mxu0 %vm68_vm0, %v66_v4  ;;  %v167_v55 = vsel %vm106_vm2, %v162_v54, 0  ;;  %v222_v25 = vld [vmem:[#allocation7 + $0x8] sm:$0xf]  ;;  %s774_s9 = smov 8   ;;  %s775_s4 = smov [#allocation8]  }
  0x19   :  { %584 = vmatmul.msk.bf16.vlgmr.msra.gmra.mxu2 %vm68_vm0, %v125_v5  ;;  %261 = vmatpush.bf16.xpose.msrb.mxu0 %v252_v7  ;;  %v227_v26 = vsel %vm106_vm2, %v222_v25, 0  ;;  %s548_s10 = sshll.u32 %s775_s4, 4  ;;  %s550_s13 = sshll.u32 %s891_s3, 4  ;;  %s549_s10 = int_to_ptr.vmem [resolvable:$true] %s548_s10  ;;  %s551_s13 = int_to_ptr.hbm [resolvable:$true] %s550_s13 }
  0x1a   :  { %201 = vmatpush.bf16.xpose.msrb.mxu1 %v192_v33  ;;  %176 = vmatpush.bf16.msra.mxu3 %v167_v55 }
  0x1e   :  { %236 = vmatpush.bf16.msrb.mxu3 %v227_v26 }
  0x21   :  { %381 = vmatpush.bf16.xpose.msra.mxu0 %v372_v13 }
  0x28   :  { %588 = vmatmul.msk.bf16.vlgmr.msrb.gmra.mxu0 %vm68_vm0, %v245_v8 }
  0x29   :  { %501 = vmatpush.bf16.xpose.msrb.mxu0 %v492_v45 }
  0x38   :  { %592 = vmatmul.msk.bf16.vlgmr.msra.gmra.mxu0 %vm68_vm0, %v365_v14 }
  0x48   :  { %596 = vmatmul.msk.bf16.vlgmr.msrb.gmra.mxu0 %vm68_vm0, %v485_v46 }
  0x95   :  { %v84_v9 = vpop.f32.mrf.mxu0 }
  0x96   :  { %v89_v10 = vsel %vm88_vm1, %v84_v9, -inf }
  0x97   :  { %90 = vmax.xlane.f32.xlu0 %v89_v10 }
  0x9c   :  { %v143_v15 = vpop.f32.mrf.mxu2 }
  0x9d   :  { %v86_v11 = vpop.f32.mrf.mxu0  ;;  %v147_v16 = vsel %vm88_vm1, %v143_v15, -inf }
  0x9e   :  { %148 = vmax.xlane.f32.xlu1 %v147_v16 }
  0xa4   :  { %v145_v17 = vpop.f32.mrf.mxu2 }
  0xa5   :  { %v820_v18 = vpop.f32.mrf.mxu0 }
  0xa6   :  { %v267_v37 = vsel %vm88_vm1, %v820_v18, -inf }
  0xa7   :  { %268 = vmax.xlane.f32.xlu2 %v267_v37 }
  0xad   :  { %v265_v21 = vpop.f32.mrf.mxu0 }
  0xae   :  { %v282_v21 = vld [vmem:[#allocation7 + $0xc] sm:$0xf] }
  0xb5   :  { %v824_v30 = vpop.f32.mrf.mxu0 }
  0xb6   :  { %v387_v31 = vsel %vm88_vm1, %v824_v30, -inf }
  0xbd   :  { %v385_v36 = vpop.f32.mrf.mxu0 }
  0xc5   :  { %v503_v61 = vpop.f32.mrf.mxu0 }
  0xc6   :  { %v507_v7 = vsel %vm88_vm1, %v503_v61, -inf }
  0xcd   :  { %v505_v63 = vpop.f32.mrf.mxu0 }
 0x10a   :  { %v91_v19 = vpop.xlane.xlu0 %90 }
 0x10b   :  { %v92_v20 = vsub.f32 %v84_v9, %v91_v19 }
 0x10d   :  { %v93_v22 = vmul.f32 1.442695, %v92_v20 }
 0x10f   :  { %607 = vpow2.f32 %v93_v22  ;;  %v287_v22 = vsel %vm106_vm2, %v282_v21, 0 }
 0x110   :  { %296 = vmatpush.bf16.msrb.mxu2 %v287_v22 }
 0x111   :  { %v149_v27 = vpop.xlane.xlu1 %148 }
 0x112   :  { %v150_v28 = vsub.f32 %v143_v15, %v149_v27 }
 0x114   :  { %v151_v29 = vmul.f32 1.442695, %v150_v28 }
 0x115   :  { %v608_v23 = vpop.eup %607 }
 0x116   :  { %v95_v24 = vsel %vm88_vm1, %v608_v23, 0.0  ;;  %609 = vpow2.f32 %v151_v29 }
 0x117   :  { %96 = vadd.xlane.f32.xlu0 %v95_v24 }
 0x11a   :  { %v269_v2 = vpop.xlane.xlu2 %268 }
 0x11b   :  { %v270_v3 = vsub.f32 %v820_v18, %v269_v2 }
 0x11c   :  { %v610_v34 = vpop.eup %609 }
 0x11d   :  { %v153_v35 = vsel %vm88_vm1, %v610_v34, 0.0  ;;  %v271_v6 = vmul.f32 1.442695, %v270_v3 }
 0x11f   :  { %388 = vmax.xlane.f32.xlu0 %v387_v31 }
 0x127   :  { %154 = vadd.xlane.f32.xlu0 %v153_v35 }
 0x18a   :  { %v97_v38 = vpop.xlane.xlu0 %96 }
 0x18b   :  { %611 = vrcp.f32 %v97_v38 }
 0x191   :  { %v612_v39 = vpop.eup %611 }
 0x192   :  { %v99_v41 = vmul.f32 %v612_v39, %v608_v23  ;;  %v389_v52 = vpop.xlane.xlu0 %388 }
 0x193   :  { %v390_v18 = vsub.f32 %v824_v30, %v389_v52  ;;  %v522_v52 = vld [vmem:[#allocation7 + $0x1c] sm:$0xf] }
 0x194   :  { %100 = vst.msk [vmem:[#allocation9] sm:$0xff] %vm88_vm1, %v99_v41  ;;  %v101_v42 = vpack.c.bf16 %v99_v41, %v99_v41  ;;  %v527_v54 = vsel %vm106_vm2, %v522_v52, 0 }
 0x195   :  { %v391_v20 = vmul.f32 1.442695, %v390_v18 }
 0x196   :  { %583 = vmatmul.msk.bf16.vlgmr.msra.gmra.mxu1 %vm88_vm1, %v101_v42 }
 0x197   :  { %321 = vmatpush.bf16.xpose.msra.mxu1 %v312_v43 }
 0x19a   :  { %v155_v53 = vpop.xlane.xlu0 %154 }
 0x19b   :  { %613 = vrcp.f32 %v155_v53 }
 0x19c   :  { %615 = vpow2.f32 %v271_v6 }
 0x1a1   :  { %v614_v56 = vpop.eup %613 }
 0x1a2   :  { %v157_v57 = vmul.f32 %v614_v56, %v610_v34  ;;  %v616_v9 = vpop.eup %615  ;;  %v462_v56 = vld [vmem:[#allocation7 + $0x18] sm:$0xf] }
 0x1a3   :  { %v273_v12 = vsel %vm88_vm1, %v616_v9, 0.0 }
 0x1a4   :  { %159 = vst.msk [vmem:[#allocation9 + $0x8] sm:$0xff] %vm88_vm1, %v157_v57  ;;  %v160_v58 = vpack.c.bf16 %v157_v57, %v157_v57 }
 0x1a6   :  { %586 = vmatmul.msk.bf16.vlgmr.msrb.gmra.mxu1 %vm68_vm0, %v185_v48  ;;  %585 = vmatmul.msk.bf16.vlgmr.msra.gmra.mxu3 %vm88_vm1, %v160_v58  ;;  %v402_v48 = vld [vmem:[#allocation7 + $0x14] sm:$0xf] }
 0x1a7   :  { %441 = vmatpush.bf16.xpose.msrb.mxu1 %v432_v49  ;;  %v407_v49 = vsel %vm106_vm2, %v402_v48, 0 }
 0x1a8   :  { %416 = vmatpush.bf16.msra.mxu2 %v407_v49 }
 0x1b6   :  { %590 = vmatmul.msk.bf16.vlgmr.msra.gmra.mxu1 %vm68_vm0, %v305_v50  ;;  %v342_v50 = vld [vmem:[#allocation7 + $0x10] sm:$0xf] }
 0x1c6   :  { %594 = vmatmul.msk.bf16.vlgmr.msrb.gmra.mxu1 %vm68_vm0, %v425_v51  ;;  %v347_v51 = vsel %vm106_vm2, %v342_v50, 0 }
 0x1c7   :  { %356 = vmatpush.bf16.msra.mxu3 %v347_v51 }
 0x213   :  { %v119_v59 = vpop.f32.mrf.mxu1 }
 0x214   :  { %123 = vst.msk [vmem:[#allocation8] sm:$0xff] %vm68_vm0, %v119_v59 }
 0x21b   :  { %v121_v60 = vpop.f32.mrf.mxu1 }
 0x21c   :  { %v467_v60 = vsel %vm106_vm2, %v462_v56, 0 }
 0x223   :  { %v203_v62 = vpop.f32.mrf.mxu1 }
 0x224   :  { %v207_v0 = vsel %vm88_vm1, %v203_v62, -inf }
 0x225   :  { %208 = vmax.xlane.f32.xlu1 %v207_v0 }
 0x229   :  { %v178_v14 = vpop.f32.mrf.mxu3 }
 0x22a   :  { %183 = vst.msk [vmem:[#allocation8 + $0x8] sm:$0xff] %vm68_vm0, %v178_v14 }
 0x22b   :  { %v205_v1 = vpop.f32.mrf.mxu1 }
 0x231   :  { %v180_v15 = vpop.f32.mrf.mxu3 }
 0x233   :  { %v323_v4 = vpop.f32.mrf.mxu1 }
 0x234   :  { %v327_v5 = vsel %vm88_vm1, %v323_v4, -inf }
 0x235   :  { %328 = vmax.xlane.f32.xlu2 %v327_v5 }
 0x23b   :  { %v325_v8 = vpop.f32.mrf.mxu1 }
 0x23d   :  { %508 = vmax.xlane.f32.xlu2 %v507_v7 }
 0x243   :  { %v443_v10 = vpop.f32.mrf.mxu1 }
 0x244   :  { %v447_v11 = vsel %vm88_vm1, %v443_v10, -inf }
 0x245   :  { %448 = vmax.xlane.f32.xlu1 %v447_v11  ;;  %274 = vadd.xlane.f32.xlu2 %v273_v12 }
 0x24b   :  { %v445_v13 = vpop.f32.mrf.mxu1 }
 0x298   :  { %v209_v16 = vpop.xlane.xlu1 %208 }
 0x299   :  { %v210_v17 = vsub.f32 %v203_v62, %v209_v16 }
 0x29b   :  { %v211_v19 = vmul.f32 1.442695, %v210_v17 }
 0x29d   :  { %617 = vpow2.f32 %v211_v19 }
 0x29e   :  { %619 = vpow2.f32 %v391_v20 }
 0x2a3   :  { %v618_v23 = vpop.eup %617 }
 0x2a4   :  { %v213_v24 = vsel %vm88_vm1, %v618_v23, 0.0  ;;  %v620_v28 = vpop.eup %619 }
 0x2a5   :  { %214 = vadd.xlane.f32.xlu1 %v213_v24  ;;  %v393_v31 = vsel %vm88_vm1, %v620_v28, 0.0 }
 0x2a8   :  { %v329_v27 = vpop.xlane.xlu2 %328 }
 0x2a9   :  { %v330_v29 = vsub.f32 %v323_v4, %v329_v27 }
 0x2ab   :  { %v331_v30 = vmul.f32 1.442695, %v330_v29 }
 0x2ad   :  { %621 = vpow2.f32 %v331_v30  ;;  %394 = vadd.xlane.f32.xlu1 %v393_v31 }
 0x2b0   :  { %v509_v32 = vpop.xlane.xlu2 %508 }
 0x2b1   :  { %v510_v33 = vsub.f32 %v503_v61, %v509_v32 }
 0x2b3   :  { %v622_v34 = vpop.eup %621  ;;  %v511_v35 = vmul.f32 1.442695, %v510_v33 }
 0x2b4   :  { %v333_v36 = vsel %vm88_vm1, %v622_v34, 0.0 }
 0x2b5   :  { %623 = vpow2.f32 %v511_v35  ;;  %334 = vadd.xlane.f32.xlu0 %v333_v36 }
 0x2b8   :  { %v449_v37 = vpop.xlane.xlu1 %448  ;;  %v275_v38 = vpop.xlane.xlu2 %274 }
 0x2b9   :  { %v450_v39 = vsub.f32 %v443_v10, %v449_v37  ;;  %625 = vrcp.f32 %v275_v38 }
 0x2bb   :  { %v624_v40 = vpop.eup %623  ;;  %v451_v41 = vmul.f32 1.442695, %v450_v39 }
 0x2bc   :  { %v513_v42 = vsel %vm88_vm1, %v624_v40, 0.0 }
 0x2bd   :  { %627 = vpow2.f32 %v451_v41  ;;  %514 = vadd.xlane.f32.xlu0 %v513_v42 }
 0x2bf   :  { %v626_v43 = vpop.eup %625 }
 0x2c0   :  { %v277_v44 = vmul.f32 %v626_v43, %v616_v9 }
 0x2c2   :  { %279 = vst.msk [vmem:[#allocation9 + $0x18] sm:$0xff] %vm88_vm1, %v277_v44  ;;  %v280_v45 = vpack.c.bf16 %v277_v44, %v277_v44 }
 0x2c3   :  { %v628_v46 = vpop.eup %627 }
 0x2c4   :  { %589 = vmatmul.msk.bf16.vlgmr.msrb.gmra.mxu2 %vm88_vm1, %v280_v45  ;;  %v453_v47 = vsel %vm88_vm1, %v628_v46, 0.0 }
 0x2c5   :  { %454 = vadd.xlane.f32.xlu2 %v453_v47  ;;  %536 = vmatpush.bf16.msrb.mxu2 %v527_v54 }
 0x318   :  { %v215_v53 = vpop.xlane.xlu1 %214 }
 0x319   :  { %629 = vrcp.f32 %v215_v53 }
 0x31f   :  { %v630_v55 = vpop.eup %629 }
 0x320   :  { %v217_v57 = vmul.f32 %v630_v55, %v618_v23  ;;  %v395_v58 = vpop.xlane.xlu1 %394 }
 0x321   :  { %631 = vrcp.f32 %v395_v58 }
 0x322   :  { %219 = vst.msk [vmem:[#allocation9 + $0x10] sm:$0xff] %vm88_vm1, %v217_v57  ;;  %v220_v59 = vpack.c.bf16 %v217_v57, %v217_v57 }
 0x324   :  { %587 = vmatmul.msk.bf16.vlgmr.msrb.gmra.mxu3 %vm88_vm1, %v220_v59 }
 0x325   :  { %476 = vmatpush.bf16.msrb.mxu3 %v467_v60 }
 0x327   :  { %v632_v61 = vpop.eup %631 }
 0x328   :  { %v397_v62 = vmul.f32 %v632_v61, %v620_v28  ;;  %v335_v63 = vpop.xlane.xlu0 %334 }
 0x329   :  { %633 = vrcp.f32 %v335_v63 }
 0x32a   :  { %399 = vst.msk [vmem:[#allocation9 + $0x28] sm:$0xff] %vm88_vm1, %v397_v62  ;;  %v400_v0 = vpack.c.bf16 %v397_v62, %v397_v62 }
 0x32c   :  { %593 = vmatmul.msk.bf16.vlgmr.msra.gmra.mxu2 %vm88_vm1, %v400_v0 }
 0x32f   :  { %v634_v1 = vpop.eup %633 }
 0x330   :  { %v337_v2 = vmul.f32 %v634_v1, %v622_v34  ;;  %v515_v3 = vpop.xlane.xlu0 %514 }
 0x331   :  { %635 = vrcp.f32 %v515_v3 }
 0x332   :  { %339 = vst.msk [vmem:[#allocation9 + $0x20] sm:$0xff] %vm88_vm1, %v337_v2  ;;  %v340_v4 = vpack.c.bf16 %v337_v2, %v337_v2 }
 0x334   :  { %591 = vmatmul.msk.bf16.vlgmr.msra.gmra.mxu3 %vm88_vm1, %v340_v4 }
 0x337   :  { %v636_v5 = vpop.eup %635 }
 0x338   :  { %v517_v6 = vmul.f32 %v636_v5, %v624_v40  ;;  %v455_v7 = vpop.xlane.xlu2 %454 }
 0x339   :  { %637 = vrcp.f32 %v455_v7 }
 0x33a   :  { %519 = vst.msk [vmem:[#allocation9 + $0x38] sm:$0xff] %vm88_vm1, %v517_v6  ;;  %v520_v8 = vpack.c.bf16 %v517_v6, %v517_v6 }
 0x33c   :  { %597 = vmatmul.msk.bf16.vlgmr.msrb.gmra.mxu2 %vm88_vm1, %v520_v8 }
 0x33f   :  { %v638_v9 = vpop.eup %637 }
 0x340   :  { %v457_v10 = vmul.f32 %v638_v9, %v628_v46 }
 0x342   :  { %459 = vst.msk [vmem:[#allocation9 + $0x30] sm:$0xff] %vm88_vm1, %v457_v10  ;;  %v460_v11 = vpack.c.bf16 %v457_v10, %v457_v10 }
 0x343   :  { %569 = dma.vmem_to_hbm [thread:$0]  %s562_s2, 1024, %s564_s7, [#allocation10], %s773_s8, %s773_s8, %s774_s9  }
 0x344   :  { %595 = vmatmul.msk.bf16.vlgmr.msrb.gmra.mxu3 %vm88_vm1, %v460_v11 }
 0x347   :  { %v298_v12 = vpop.f32.mrf.mxu2 }
 0x348   :  { %303 = vst.msk [vmem:[#allocation8 + $0x18] sm:$0xff] %vm68_vm0, %v298_v12 }
 0x34f   :  { %v300_v13 = vpop.f32.mrf.mxu2 }
 0x3a7   :  { %v238_v14 = vpop.f32.mrf.mxu3 }
 0x3a8   :  { %243 = vst.msk [vmem:[#allocation8 + $0x10] sm:$0xff] %vm68_vm0, %v238_v14 }
 0x3af   :  { %v240_v15 = vpop.f32.mrf.mxu3  ;;  %v418_v16 = vpop.f32.mrf.mxu2 }
 0x3b0   :  { %423 = vst.msk [vmem:[#allocation8 + $0x28] sm:$0xff] %vm68_vm0, %v418_v16 }
 0x3b7   :  { %v358_v17 = vpop.f32.mrf.mxu3  ;;  %v420_v18 = vpop.f32.mrf.mxu2 }
 0x3b8   :  { %363 = vst.msk [vmem:[#allocation8 + $0x20] sm:$0xff] %vm68_vm0, %v358_v17 }
 0x3bf   :  { %v360_v19 = vpop.f32.mrf.mxu3  ;;  %v538_v20 = vpop.f32.mrf.mxu2 }
 0x3c0   :  { %543 = vst.msk [vmem:[#allocation8 + $0x38] sm:$0xff] %vm68_vm0, %v538_v20 }
 0x3c7   :  { %v478_v21 = vpop.f32.mrf.mxu3  ;;  %v540_v22 = vpop.f32.mrf.mxu2 }
 0x3c8   :  { %483 = vst.msk [vmem:[#allocation8 + $0x30] sm:$0xff] %vm68_vm0, %v478_v21 }
 0x3c9   :  { %556 = dma.vmem_to_hbm [thread:$0]  %s549_s10, 1024, %s551_s13, [#allocation4], %s773_s8, %s773_s8, %s774_s9  }
 0x3cf   :  { %v480_v23 = vpop.f32.mrf.mxu3 }
 0x3d0   :  { %763 = dma.done.wait [#allocation4], 1024  }
 0x3d1   :  { %764 = vsyncadd [#allocation4], 4294966272 }
 0x3d2   :  { %765 = dma.done.wait [#allocation10], 1024  }
 0x3d3   :  { %766 = vsyncadd [#allocation10], 4294966272 }
 0x3d4   :  { %578 = vsyncpa [#allocation3], 1 }
 0x3d5   :  { %579 = vsyncpa [#allocation6], 1 }
 0x3d6   :  { %580 = vsyncpa [#allocation4], 1 }
 0x3d7   :  { %581 = vsyncpa [#allocation10], 1 }

</bundles_post_ra>
